<compile_context>
chip_gen: v7x
topology: tpu7x:2x2x1
jax: 0.10.0
libtpu: 0.0.40
codegen_flags: <defaults>
</compile_context>

<pallas_src>
import functools

import jax
import jax.numpy as jnp
from jax.experimental import pallas as pl
from jax.experimental.pallas import tpu as pltpu


def _round_up(x, m):
    return ((x + m - 1) // m) * m


def _vmem_capacity_bytes():
    """Physical VMEM of the attached TPU (128 MiB v5e/v6e, 64 MiB v7x)."""
    try:
        cap = getattr(pltpu.get_tpu_info(), "vmem_capacity_bytes", None)
        if cap:
            return int(cap)
    except Exception:  # interpret mode / unavailable query
        pass
    return 128 << 20


def _pick_batch_tile(B, per_image_bytes, budget_bytes, min_steps=4):
    """Largest divisor of B whose (TB, C, HW) slab fits the budget, capped so
    the grid keeps >= min_steps steps (prefetch/compute/writeback overlap) and
    preferring an even grid length (even split across v7x's two TCs)."""
    cap = max(1, budget_bytes // max(1, per_image_bytes))
    cap = min(cap, max(1, B // min_steps))
    divisors = [d for d in range(1, B + 1) if B % d == 0 and d <= cap]
    if not divisors:
        return 1
    even = [d for d in divisors if (B // d) % 2 == 0]
    return max(even) if even else max(divisors)


# ----------------------------- kernels ------------------------------------ #

def _single_pass_kernel(x_ref, wt_ref, b_ref, o_ref, *, inv_hw):
    # x_ref: (TB, C, HW_pad); wt_ref: (C_in, C_out); b_ref: (1, C).
    x = x_ref[...]
    # Global average pool: f32 accumulation without materializing an f32 slab.
    pooled = jnp.sum(x, axis=-1, dtype=jnp.float32) * inv_hw              # (TB, C)
    # 1x1 conv == pooled @ W^T + b (weight pre-transposed on host).
    logits = jnp.dot(pooled, wt_ref[...],
                     preferred_element_type=jnp.float32) + b_ref[...]     # (TB, C)
    attn = jax.nn.sigmoid(logits).astype(x.dtype)     # single cast on tiny (TB, C)
    o_ref[...] = x * attn[:, :, None]                 # lane-dense store


def _pool_fc_kernel(x_ref, wt_ref, b_ref, attn_ref, acc_ref, *, inv_hw):
    # Two-phase fallback, phase 1: accumulate spatial sums over HW chunks
    # (grid axis 1, "arbitrary"), fc + sigmoid on the final chunk.
    h = pl.program_id(1)

    @pl.when(h == 0)
    def _():
        acc_ref[...] = jnp.zeros_like(acc_ref)

    acc_ref[...] += jnp.sum(x_ref[...], axis=-1, dtype=jnp.float32)       # (TB, C)

    @pl.when(h == pl.num_programs(1) - 1)
    def _():
        pooled = acc_ref[...] * inv_hw
        logits = jnp.dot(pooled, wt_ref[...],
                         preferred_element_type=jnp.float32) + b_ref[...]
        attn_ref[...] = jax.nn.sigmoid(logits)[:, :, None]                # (TB, C, 1)


def _scale_kernel(x_ref, attn_ref, o_ref):
    # Two-phase fallback, phase 2: tiled broadcast multiply.
    x = x_ref[...]                                     # (TB, C, THW)
    o_ref[...] = x * attn_ref[...].astype(x.dtype)     # (TB, C, 1) broadcast


# --------------------------- pallas_call paths ----------------------------- #

def _single_pass(x3, w_t, b2, *, inv_hw, budget, vmem_limit, itemsize):
    B, C, HW_pad = x3.shape
    per_image_bytes = C * HW_pad * itemsize
    TB = _pick_batch_tile(B, per_image_bytes, budget)
    grid = (B // TB,)

    cost = pl.CostEstimate(
        flops=B * C * HW_pad          # pooling adds
        + 2 * B * C * C               # 1x1 conv
        + B * C * HW_pad,             # broadcast multiply
        transcendentals=B * C,        # sigmoid
        bytes_accessed=2 * B * C * HW_pad * itemsize + C * C * itemsize + C * 4,
    )

    def call(single_buffer_fc):
        if single_buffer_fc:
            # Grid-invariant operands: reclaim their second VMEM buffer.
            w_spec = pl.BlockSpec((C, C), lambda b: (0, 0),
                                  pipeline_mode=pl.Buffered(1))
            b_spec = pl.BlockSpec((1, C), lambda b: (0, 0),
                                  pipeline_mode=pl.Buffered(1))
        else:
            w_spec = pl.BlockSpec((C, C), lambda b: (0, 0))
            b_spec = pl.BlockSpec((1, C), lambda b: (0, 0))
        return pl.pallas_call(
            functools.partial(_single_pass_kernel, inv_hw=inv_hw),
            out_shape=jax.ShapeDtypeStruct((B, C, HW_pad), x3.dtype),
            grid=grid,
            in_specs=[
                pl.BlockSpec((TB, C, HW_pad), lambda b: (b, 0, 0)),  # streamed x
                w_spec,                                              # resident W^T
                b_spec,                                              # resident bias
            ],
            out_specs=pl.BlockSpec((TB, C, HW_pad), lambda b: (b, 0, 0)),
            compiler_params=pltpu.CompilerParams(
                dimension_semantics=("parallel",),   # shard batch tiles across TCs
                vmem_limit_bytes=vmem_limit),
            cost_estimate=cost,
        )(x3, w_t, b2)

    try:
        return call(single_buffer_fc=True)
    except Exception:
        # JAX/Mosaic build without pipeline_mode support: default buffering.
        return call(single_buffer_fc=False)


def _two_phase(x3, w_t, b2, *, inv_hw, budget, vmem_limit, itemsize):
    # Fallback when a single (1, C, HW_pad) image slab does not fit the budget.
    # Costs one extra HBM read of x (3 passes vs 2) but keeps blocks
    # pipeline-sized and avoids VMEM OOM (matters most on v7x's 64 MiB VMEM).
    B, C, HW_pad = x3.shape
    dtype = x3.dtype

    # Largest lane-aligned HW chunk (divisor of HW_pad) within budget.
    k = HW_pad // 128
    max_chunks = max(1, budget // max(1, C * 128 * itemsize))
    THW = 128
    for d in range(1, k + 1):
        if k % d == 0 and d <= max_chunks:
            THW = d * 128
    n_hw = HW_pad // THW

    # Phase 1: attn = sigmoid(mean_hw(x) @ W^T + b), streamed over HW chunks.
    attn = pl.pallas_call(
        functools.partial(_pool_fc_kernel, inv_hw=inv_hw),
        out_shape=jax.ShapeDtypeStruct((B, C, 1), jnp.float32),
        grid=(B, n_hw),
        in_specs=[
            pl.BlockSpec((1, C, THW), lambda b, h: (b, 0, h)),
            pl.BlockSpec((C, C), lambda b, h: (0, 0)),
            pl.BlockSpec((1, C), lambda b, h: (0, 0)),
        ],
        out_specs=pl.BlockSpec((1, C, 1), lambda b, h: (b, 0, 0)),
        scratch_shapes=[pltpu.VMEM((1, C), jnp.float32)],
        compiler_params=pltpu.CompilerParams(
            dimension_semantics=("parallel", "arbitrary"),
            vmem_limit_bytes=vmem_limit),
        cost_estimate=pl.CostEstimate(
            flops=B * C * HW_pad + 2 * B * C * C,
            transcendentals=B * C,
            bytes_accessed=B * C * HW_pad * itemsize + C * C * itemsize + C * 4),
    )(x3, w_t, b2)

    # Phase 2: out = x * attn, tiled over (batch, HW chunks), lane-dense stores.
    return pl.pallas_call(
        _scale_kernel,
        out_shape=jax.ShapeDtypeStruct((B, C, HW_pad), dtype),
        grid=(B, n_hw),
        in_specs=[
            pl.BlockSpec((1, C, THW), lambda b, h: (b, 0, h)),
            pl.BlockSpec((1, C, 1), lambda b, h: (b, 0, 0)),
        ],
        out_specs=pl.BlockSpec((1, C, THW), lambda b, h: (b, 0, h)),
        compiler_params=pltpu.CompilerParams(
            dimension_semantics=("parallel", "parallel"),
            vmem_limit_bytes=vmem_limit),
        cost_estimate=pl.CostEstimate(
            flops=B * C * HW_pad,
            transcendentals=0,
            bytes_accessed=2 * B * C * HW_pad * itemsize + B * C * 4),
    )(x3, attn)


# ------------------------------- wrapper ----------------------------------- #

def channel_attention(x_nchw, weight, bias, *, slab_budget_bytes=None):
    """x_nchw: (B, C, H, W); weight: (C, C, 1, 1); bias: (C,)."""
    B, C, H, W = x_nchw.shape
    HW = H * W
    dtype = x_nchw.dtype
    itemsize = jnp.dtype(dtype).itemsize

    # Lane-align the spatial axis so every store is an unmasked vst.
    HW_pad = max(128, _round_up(HW, 128))
    x3 = x_nchw.reshape(B, C, HW)
    if HW_pad != HW:
        x3 = jnp.pad(x3, ((0, 0), (0, 0), (0, HW_pad - HW)))

    # Pre-transpose the 1x1-conv weight on the host: (C_out, C_in) -> (C_in, C_out).
    w_t = weight.reshape(C, C).T
    b2 = bias.reshape(1, C).astype(jnp.float32)
    inv_hw = 1.0 / float(HW)   # mean uses the TRUE spatial size (pad is zeros)

    # Generation-aware VMEM budgeting: real footprint ~4x the x slab
    # (in + out, each double-buffered) -> slab budget ~VMEM/10
    # (~12.8 MiB on 128 MiB v5e/v6e, ~6.4 MiB on 64 MiB v7x); scoped VMEM
    # limit ~62% of physical, capped at 96 MiB.
    vmem_cap = _vmem_capacity_bytes()
    budget = slab_budget_bytes if slab_budget_bytes is not None else vmem_cap // 10
    vmem_limit = min((vmem_cap * 5) // 8, 96 << 20)

    per_image_bytes = C * HW_pad * itemsize
    if per_image_bytes > budget:
        out3 = _two_phase(x3, w_t, b2, inv_hw=inv_hw, budget=budget,
                          vmem_limit=vmem_limit, itemsize=itemsize)
    else:
        out3 = _single_pass(x3, w_t, b2, inv_hw=inv_hw, budget=budget,
                            vmem_limit=vmem_limit, itemsize=itemsize)

    if HW_pad != HW:
        out3 = out3[:, :, :HW]
    return out3.reshape(B, C, H, W)


def channel_attention_ref(x_nchw, weight, bias):
    """Pure-JAX reference mirroring the PyTorch forward."""
    pooled = jnp.mean(x_nchw, axis=(2, 3))                       # (B, C)
    logits = pooled @ weight.reshape(weight.shape[0], -1).T + bias
    attn = jax.nn.sigmoid(logits)
    return x_nchw * attn[:, :, None, None]


if __name__ == "__main__":
    key = jax.random.PRNGKey(0)
    kx, kw, kb, kx2 = jax.random.split(key, 4)

    B, C, H, W = 2, 4, 16, 16
    x = jax.random.normal(kx, (B, C, H, W), dtype=jnp.float32)
    # Deterministic synthetic parameters (Conv2d(C, C, 1, bias=True) shapes).
    weight = jax.random.normal(kw, (C, C, 1, 1), dtype=jnp.float32) * 0.1
    bias = jax.random.normal(kb, (C,), dtype=jnp.float32) * 0.1

    ref = channel_attention_ref(x, weight, bias)

    # Single-pass path (H*W already a multiple of 128).
    out = jax.block_until_ready(channel_attention(x, weight, bias))
    assert out.shape == (B, C, H, W)
    assert jnp.allclose(out, ref, atol=1e-5, rtol=1e-5)

    # Lane-padding path (H*W = 100 -> padded to 128, pad sliced off).
    x_odd = jax.random.normal(kx2, (B, C, 10, 10), dtype=jnp.float32)
    out_odd = jax.block_until_ready(channel_attention(x_odd, weight, bias))
    assert jnp.allclose(out_odd, channel_attention_ref(x_odd, weight, bias),
                        atol=1e-5, rtol=1e-5)

    # Two-phase fallback (force a tiny slab budget so one image doesn't "fit").
    out_tp = jax.block_until_ready(
        channel_attention(x, weight, bias, slab_budget_bytes=1024))
    assert jnp.allclose(out_tp, ref, atol=1e-5, rtol=1e-5)

    print("KERNEL_OK")
</pallas_src>

<mosaic_0001>
module attributes {stable_mosaic.version = 11 : i64} {
  func.func @_single_pass_kernel(%arg0: i32, %arg1: memref<1x4x256xf32, #tpu.memory_space<vmem>>, %arg2: memref<4x4xf32, #tpu.memory_space<vmem>>, %arg3: memref<1x4xf32, #tpu.memory_space<vmem>>, %arg4: memref<1x4x256xf32, #tpu.memory_space<vmem>>) attributes {dimension_semantics = [#tpu.dimension_semantics<parallel>], iteration_bounds = array<i64: 2>, scalar_prefetch = 0 : i64, scratch_operands = 0 : i64, tpu.core_type = #tpu.core_type<tc>, window_params = [{transform_indices = @transform_0, window_bounds = array<i64: 1, 4, 256>}, {pipeline_mode = #tpu.pipeline_mode<synchronous>, transform_indices = @transform_1, window_bounds = array<i64: 4, 4>}, {pipeline_mode = #tpu.pipeline_mode<synchronous>, transform_indices = @transform_2, window_bounds = array<i64: 1, 4>}, {transform_indices = @transform_3, window_bounds = array<i64: 1, 4, 256>}]} {
    %c0 = arith.constant 0 : index
    %c0_0 = arith.constant 0 : index
    %c0_1 = arith.constant 0 : index
    %0 = vector.load %arg1[%c0, %c0_0, %c0_1] : memref<1x4x256xf32, #tpu.memory_space<vmem>>, vector<1x4x256xf32>
    %cst = arith.constant dense<0.000000e+00> : vector<1x4xf32>
    %1 = vector.multi_reduction <add>, %0, %cst [2] : vector<1x4x256xf32> to vector<1x4xf32>
    %cst_2 = arith.constant 3.906250e-03 : f32
    %2 = vector.broadcast %cst_2 : f32 to vector<1x4xf32>
    %3 = arith.mulf %1, %2 : vector<1x4xf32>
    %c0_3 = arith.constant 0 : index
    %c0_4 = arith.constant 0 : index
    %4 = vector.load %arg2[%c0_3, %c0_4] : memref<4x4xf32, #tpu.memory_space<vmem>>, vector<4x4xf32>
    %cst_5 = arith.constant dense<0.000000e+00> : vector<1x4xf32>
    %5 = tpu.matmul %3, %4, %cst_5 {dimension_numbers = #tpu.dot_dimension_numbers<[1], [0], [0], [1], [0, 0, 1, 1], [], []>} : vector<1x4xf32>, vector<4x4xf32>, vector<1x4xf32> -> vector<1x4xf32>
    %c0_6 = arith.constant 0 : index
    %c0_7 = arith.constant 0 : index
    %6 = vector.load %arg3[%c0_6, %c0_7] : memref<1x4xf32, #tpu.memory_space<vmem>>, vector<1x4xf32>
    %7 = arith.addf %5, %6 : vector<1x4xf32>
    %8 = arith.negf %7 : vector<1x4xf32>
    %9 = math.exp %8 : vector<1x4xf32>
    %cst_8 = arith.constant 1.000000e+00 : f32
    %10 = vector.broadcast %cst_8 : f32 to vector<1x4xf32>
    %11 = arith.addf %10, %9 : vector<1x4xf32>
    %12 = arith.divf %10, %11 : vector<1x4xf32>
    %13 = vector.shape_cast %12 : vector<1x4xf32> to vector<1x4x1xf32>
    %14 = vector.broadcast %13 : vector<1x4x1xf32> to vector<1x4x256xf32>
    %15 = arith.mulf %0, %14 : vector<1x4x256xf32>
    %c0_9 = arith.constant 0 : index
    %c0_10 = arith.constant 0 : index
    %c0_11 = arith.constant 0 : index
    %16 = vector.load %arg4[%c0_9, %c0_10, %c0_11] : memref<1x4x256xf32, #tpu.memory_space<vmem>>, vector<1x4x256xf32>
    tpu.vector_store %arg4[%c0_9, %c0_10, %c0_11], %15 {strides = array<i32>} : memref<1x4x256xf32, #tpu.memory_space<vmem>>, vector<1x4x256xf32>,
    return
  }
  func.func @transform_0(%arg0: i32) -> (i32, i32, i32) {
    %c0_i32 = arith.constant 0 : i32
    %c0_i32_0 = arith.constant 0 : i32
    %c0_i32_1 = arith.constant 0 : i32
    return %arg0, %c0_i32, %c0_i32_0 : i32, i32, i32
  }
  func.func @transform_1(%arg0: i32) -> (i32, i32) {
    %c0_i32 = arith.constant 0 : i32
    %c0_i32_0 = arith.constant 0 : i32
    %c0_i32_1 = arith.constant 0 : i32
    return %c0_i32, %c0_i32_0 : i32, i32
  }
  func.func @transform_2(%arg0: i32) -> (i32, i32) {
    %c0_i32 = arith.constant 0 : i32
    %c0_i32_0 = arith.constant 0 : i32
    %c0_i32_1 = arith.constant 0 : i32
    return %c0_i32, %c0_i32_0 : i32, i32
  }
  func.func @transform_3(%arg0: i32) -> (i32, i32, i32) {
    %c0_i32 = arith.constant 0 : i32
    %c0_i32_0 = arith.constant 0 : i32
    %c0_i32_1 = arith.constant 0 : i32
    return %arg0, %c0_i32, %c0_i32_0 : i32, i32, i32
  }
}

module attributes {stable_mosaic.version = 11 : i64} {
  func.func @_single_pass_kernel(%arg0: i32, %arg1: memref<1x4x256xf32, #tpu.memory_space<vmem>>, %arg2: memref<4x4xf32, #tpu.memory_space<vmem>>, %arg3: memref<1x4xf32, #tpu.memory_space<vmem>>, %arg4: memref<1x4x256xf32, #tpu.memory_space<vmem>>) attributes {dimension_semantics = [#tpu.dimension_semantics<parallel>], iteration_bounds = array<i64: 2>, scalar_prefetch = 0 : i64, scratch_operands = 0 : i64, tpu.core_type = #tpu.core_type<tc>, window_params = [{transform_indices = @transform_0, window_bounds = array<i64: 1, 4, 256>}, {pipeline_mode = #tpu.pipeline_mode<synchronous>, transform_indices = @transform_1, window_bounds = array<i64: 4, 4>}, {pipeline_mode = #tpu.pipeline_mode<synchronous>, transform_indices = @transform_2, window_bounds = array<i64: 1, 4>}, {transform_indices = @transform_3, window_bounds = array<i64: 1, 4, 256>}]} {
    %c0 = arith.constant 0 : index
    %c0_0 = arith.constant 0 : index
    %c0_1 = arith.constant 0 : index
    %0 = vector.load %arg1[%c0, %c0_0, %c0_1] : memref<1x4x256xf32, #tpu.memory_space<vmem>>, vector<1x4x256xf32>
    %cst = arith.constant dense<0.000000e+00> : vector<1x4xf32>
    %1 = vector.multi_reduction <add>, %0, %cst [2] : vector<1x4x256xf32> to vector<1x4xf32>
    %cst_2 = arith.constant 3.906250e-03 : f32
    %2 = vector.broadcast %cst_2 : f32 to vector<1x4xf32>
    %3 = arith.mulf %1, %2 : vector<1x4xf32>
    %c0_3 = arith.constant 0 : index
    %c0_4 = arith.constant 0 : index
    %4 = vector.load %arg2[%c0_3, %c0_4] : memref<4x4xf32, #tpu.memory_space<vmem>>, vector<4x4xf32>
    %cst_5 = arith.constant dense<0.000000e+00> : vector<1x4xf32>
    %5 = tpu.matmul %3, %4, %cst_5 {dimension_numbers = #tpu.dot_dimension_numbers<[1], [0], [0], [1], [0, 0, 1, 1], [], []>} : vector<1x4xf32>, vector<4x4xf32>, vector<1x4xf32> -> vector<1x4xf32>
    %c0_6 = arith.constant 0 : index
    %c0_7 = arith.constant 0 : index
    %6 = vector.load %arg3[%c0_6, %c0_7] : memref<1x4xf32, #tpu.memory_space<vmem>>, vector<1x4xf32>
    %7 = arith.addf %5, %6 : vector<1x4xf32>
    %8 = arith.negf %7 : vector<1x4xf32>
    %9 = math.exp %8 : vector<1x4xf32>
    %cst_8 = arith.constant 1.000000e+00 : f32
    %10 = vector.broadcast %cst_8 : f32 to vector<1x4xf32>
    %11 = arith.addf %10, %9 : vector<1x4xf32>
    %12 = arith.divf %10, %11 : vector<1x4xf32>
    %13 = vector.shape_cast %12 : vector<1x4xf32> to vector<1x4x1xf32>
    %14 = vector.broadcast %13 : vector<1x4x1xf32> to vector<1x4x256xf32>
    %15 = arith.mulf %0, %14 : vector<1x4x256xf32>
    %c0_9 = arith.constant 0 : index
    %c0_10 = arith.constant 0 : index
    %c0_11 = arith.constant 0 : index
    %16 = vector.load %arg4[%c0_9, %c0_10, %c0_11] : memref<1x4x256xf32, #tpu.memory_space<vmem>>, vector<1x4x256xf32>
    tpu.vector_store %arg4[%c0_9, %c0_10, %c0_11], %15 {strides = array<i32>} : memref<1x4x256xf32, #tpu.memory_space<vmem>>, vector<1x4x256xf32>,
    return
  }
  func.func @transform_0(%arg0: i32) -> (i32, i32, i32) {
    %c0_i32 = arith.constant 0 : i32
    %c0_i32_0 = arith.constant 0 : i32
    %c0_i32_1 = arith.constant 0 : i32
    return %arg0, %c0_i32, %c0_i32_0 : i32, i32, i32
  }
  func.func @transform_1(%arg0: i32) -> (i32, i32) {
    %c0_i32 = arith.constant 0 : i32
    %c0_i32_0 = arith.constant 0 : i32
    %c0_i32_1 = arith.constant 0 : i32
    return %c0_i32, %c0_i32_0 : i32, i32
  }
  func.func @transform_2(%arg0: i32) -> (i32, i32) {
    %c0_i32 = arith.constant 0 : i32
    %c0_i32_0 = arith.constant 0 : i32
    %c0_i32_1 = arith.constant 0 : i32
    return %c0_i32, %c0_i32_0 : i32, i32
  }
  func.func @transform_3(%arg0: i32) -> (i32, i32, i32) {
    %c0_i32 = arith.constant 0 : i32
    %c0_i32_0 = arith.constant 0 : i32
    %c0_i32_1 = arith.constant 0 : i32
    return %arg0, %c0_i32, %c0_i32_0 : i32, i32, i32
  }
}

</mosaic_0001>

<bundles_post_ra>
// kernel: tpu_custom_call.1
= control target key start
LH: loop header
LB: loop body
LE: loop exit
PB: predicated region body
PF: predicated region fallthrough
CT: control target
= control target key end

     0   :  { %8 = vsyncpa [#allocation3], 0  ;;  %s956_s0 = inlined_call_operand.hbm [shape: f32[2,4,256], index: 0, kind: input, shape index: {}]   ;;  %s957_s1 = inlined_call_operand.hbm [shape: f32[4,4], index: 1, kind: input, shape index: {}]   ;;  %s958_s2 = inlined_call_operand.hbm [shape: f32[1,4], index: 2, kind: input, shape index: {}]   ;;  %s959_s3 = inlined_call_operand.hbm [shape: f32[2,4,256], index: 3, kind: output, shape index: {}]  }
   0x1   :  { %10 = vsyncpa [#allocation3 + $0x1], 0 }
   0x2   :  { %11 = vsyncpa [#allocation6], 0 }
   0x3   :  { %12 = vsyncpa [#allocation4], 0 }
   0x4   :  { %14 = vsyncpa [#allocation4 + $0x1], 0  ;;  %s726_s12 = smov 0   ;;  %s728_s13 = smov 0  }
   0x5   :  { %s730_s14 = smov 0   ;;  %s732_s15 = smov 0  }
   0x6 LB: > { %s747_s16 = sadd.s32 4294967295, %s697_s15   ;;  %s436_s17 = sadd.s32 4294967294, %s697_s15   ;;  %s697_s15 = sphi %s732_s15, %s979_s15   ;;  %s693_s14 = sphi %s730_s14, %s978_s14   ;;  %s689_s13 = sphi %s728_s13, %s977_s13   ;;  %s685_s12 = sphi %s726_s12, %s976_s12  }
   0x7   : > { %p40_p0 = scmp.ne.s32.totalorder %s689_s13, %s685_s12  ;;  %p960_p1 = scmp.eq.s32.totalorder %s747_s16, 0 }
   0x8   : > { %p112_p3 = scmp.eq.s32.totalorder %s436_s17, 1  ;;  %p437_p5 = scmp.ge.s32.totalorder %s697_s15, 1 }
   0x9   : > { %p756_p4 = por %p960_p1, %p40_p0  ;;  %p119_p7 = scmp.lt.s32.totalorder %s697_s15, 3 }
   0xa   : > { %p761_p6 = por %p112_p3, %p40_p0  ;;  %s699_s21 = smov [#allocation5]  }
   0xb   : > { %s963_s18 = scalar_select %p756_p4, 1, 0 }
   0xc   : > { %s964_s19 = scalar_select %p761_p6, 1, 0 }
   0xd   : > { %p766_p8 = pnand %p437_p5, %p119_p7  ;;  %s132_s22 = sshll.u32 %s699_s21, 4  ;;  %s133_s22 = int_to_ptr.vmem [resolvable:$true] %s132_s22 }
   0xe   : > { %s700_s23 = smov [#allocation7]   ;;  %s782_s26 = sadd.s32 1, %s697_s15  }
   0xf   : > { %s965_s20 = scalar_select %p766_p8, 1, 0 }
  0x10   : > { %p478_p10 = pneg %p766_p8  ;;  %s143_s24 = sshll.u32 %s700_s23, 4  ;;  %s779_s24 = int_to_ptr.vmem [resolvable:$true] %s143_s24 }
  0x11   : > { %s24_s27 = ssub.s32 %s697_s15, %s782_s26  ;;  %s541_s30 = scalar_lea.hbm %s957_s1, 64 }
  0x12   : > { %p775_p11 = pnand %p478_p10, %p960_p1  ;;  %p542_p12 = scmp.ne.s32.totalorder %s957_s1, %s541_s30 }
  0x13   : > { %p548_p5 = scmp.lt.u32.totalorder %s541_s30, %s957_s1 }
  0x14   : > { %p543_p13 = pneg %p775_p11 }
  0x16   : > { %p544_p0 = pnand %p543_p13, %p542_p12 }
  0x18   : > { %p545_p3 = pneg %p544_p0 }
  0x1a   : > { %p550_p7 = pnand %p548_p5, %p545_p3 }
  0x1c   : > { %553 = shalt.err (!%p550_p7)
}
  0x1d   : > { %s554_s8 = scalar_lea.vmem %s133_s22, 64  ;;  %p562_p2 = scmp.lt.s32.totalorder %s133_s22, %s133_s22 }
  0x1e   : > { %p555_p10 = scmp.ne.s32.totalorder %s133_s22, %s554_s8  ;;  %p563_p6 = scmp.lt.s32.totalorder %s554_s8, %s554_s8 }
  0x20   : > { %p557_p9 = pnand %p555_p10, %p543_p13  ;;  %p564_p4 = por %p563_p6, %p562_p2 }
  0x22   : > { %p558_p1 = pneg %p557_p9 }
  0x24   : > { %p565_p8 = pnand %p564_p4, %p558_p1 }
  0x26   : > { %568 = shalt.err (!%p565_p8)
}
  0x27   : > { %481 = dma.hbm_to_vmem [thread:$0]  (!%p775_p11), %s957_s1, 64, %s133_s22, [#allocation6]  }
  0x28   : > { %s569_s21 = scalar_lea.hbm %s958_s2, 16 }
  0x29   : > { %p570_p9 = scmp.ne.s32.totalorder %s958_s2, %s569_s21  ;;  %p576_p4 = scmp.lt.u32.totalorder %s569_s21, %s958_s2 }
  0x2b   : > { %p572_p2 = pnand %p570_p9, %p543_p13 }
  0x2d   : > { %p573_p1 = pneg %p572_p2 }
  0x2f   : > { %p578_p6 = pnand %p576_p4, %p573_p1 }
  0x31   : > { %581 = shalt.err (!%p578_p6)
}
  0x32   : > { %s582_s22 = scalar_lea.vmem %s779_s24, 16  ;;  %s589_s4 = scalar_lea.vmem %s779_s24, 32 }
  0x33   : > { %p583_p8 = scmp.ne.s32.totalorder %s779_s24, %s582_s22  ;;  %p590_p3 = scmp.lt.s32.totalorder %s779_s24, %s779_s24 }
  0x34   : > { %p591_p5 = scmp.lt.s32.totalorder %s589_s4, %s582_s22 }
  0x35   : > { %p585_p12 = pnand %p583_p8, %p543_p13 }
  0x36   : > { %p592_p7 = por %p591_p5, %p590_p3 }
  0x37   : > { %p586_p0 = pneg %p585_p12 }
  0x39   : > { %p593_p10 = pnand %p592_p7, %p586_p0 }
  0x3b   : > { %596 = shalt.err (!%p593_p10)
}
  0x3c   : > { %484 = dma.hbm_to_vmem [thread:$0]  (!%p775_p11), %s958_s2, 16, %s779_s24, [#allocation6]  }
  0x3d   : > { %p25_p13 = scmp.eq.s32.totalorder %s24_s27, 0  ;;  %s27_s7 = sadd.s32 1, %s693_s14 }
  0x3e   : > { %p34_p9 = scmp.ne.s32.totalorder %s693_s14, %s689_s13  ;;  %p35_p2 = scmp.eq.s32.totalorder %s697_s15, 0 }
  0x3f   : > { %s842_s25 = scalar_select %p25_p13, %s693_s14, %s27_s7  }
  0x40   : > { %p36_p1 = por %p35_p2, %p34_p9  ;;  %p967_p4 = scmp.eq.s32.totalorder %s747_s16, 1 }
  0x41   : > { %p495_p8 = scmp.lt.s32.totalorder %s697_s15, 2  ;;  %s154_s9 = sand.u32 1, %s693_s14  }
  0x42   : > { %p846_p6 = por %p967_p4, %p34_p9  ;;  %s441_s10 = sshll.u32 %s154_s9, 3 }
  0x43   : > { %s457_s11 = sshll.u32 %s697_s15, 7  ;;  %s158_s27 = scalar_lea.vmem [#allocation2], %s441_s10 }
  0x44   : > { %s856_s24 = scalar_lea.hbm %s956_s0, %s457_s11  ;;  %s166_s23 = sshll.u32 %s158_s27, 4  ;;  %s858_s23 = int_to_ptr.vmem [resolvable:$true] %s166_s23 }
  0x45   : > { %p860_p11 = pnand %p495_p8, %p36_p1  ;;  %s155_s29 = scalar_lea.sflag [#allocation3], %s154_s9 }
  0x46   : > { %s597_s30 = scalar_lea.hbm %s856_s24, 128  ;;  %s602_s5 = scalar_lea.hbm %s956_s0, 256 }
  0x47   : > { %p598_p12 = scmp.ne.s32.totalorder %s856_s24, %s597_s30  ;;  %p599_p0 = pneg %p860_p11 }
  0x48   : > { %p603_p7 = scmp.lt.u32.totalorder %s856_s24, %s956_s0  ;;  %p604_p10 = scmp.lt.u32.totalorder %s602_s5, %s597_s30 }
  0x49   : > { %p600_p3 = pnand %p599_p0, %p598_p12  ;;  %p606_p9 = scmp.lt.u32.totalorder %s597_s30, %s856_s24 }
  0x4a   : > { %p605_p13 = por %p604_p10, %p603_p7 }
  0x4b   : > { %p601_p5 = pneg %p600_p3 }
  0x4c   : > { %p607_p2 = por %p606_p9, %p605_p13 }
  0x4e   : > { %p608_p1 = pnand %p607_p2, %p601_p5 }
  0x50   : > { %611 = shalt.err (!%p608_p1)
}
  0x51   : > { %s612_s9 = scalar_lea.vmem %s858_s23, 128  ;;  %s701_s10 = smov [#allocation2]  }
  0x52   : > { %p613_p4 = scmp.ne.s32.totalorder %s858_s23, %s612_s9  ;;  %s617_s11 = sshll.u32 %s701_s10, 4  ;;  %s618_s11 = int_to_ptr.vmem [resolvable:$false] %s617_s11 }
  0x53   : > { %s619_s17 = scalar_lea.vmem %s618_s11, 256  ;;  %p620_p3 = scmp.lt.s32.totalorder %s858_s23, %s618_s11 }
  0x54   : > { %p615_p8 = pnand %p613_p4, %p599_p0  ;;  %p621_p7 = scmp.lt.s32.totalorder %s619_s17, %s612_s9 }
  0x56   : > { %p616_p12 = pneg %p615_p8  ;;  %p622_p10 = por %p621_p7, %p620_p3 }
  0x58   : > { %p623_p13 = pnand %p622_p10, %p616_p12 }
  0x5a   : > { %626 = shalt.err (!%p623_p13)
}
  0x5b   : > { %488 = dma.hbm_to_vmem [thread:$0]  (!%p860_p11), %s856_s24, 128, %s858_s23, %s155_s29  }
  0x5c   : > { %p970_p5 = scmp.ne.s32.totalorder %s965_s20, 0 }
  0x5d   : > { %s892_s21 = sand.u32 (!%p970_p5), 1, %s689_s13   ;;  %p971_p0 = scmp.ne.s32.totalorder (!%p970_p5), %s963_s18, 0 }
  0x5e   : > { %175 = sbr.rel (%p970_p5) target bundleno = 632 (0x278), region = 32  ;;  %s445_s27 = sshll.u32 (!%p970_p5), %s892_s21, 3 }
  0x5f   : > { %s178_s30 = scalar_lea.sflag (!%p970_p5), [#allocation3], %s892_s21  ;;  %s181_s22 = scalar_lea.vmem (!%p970_p5), [#allocation2], %s445_s27 }
  0x65   : > { %672 = dma.done.wait (%p971_p0), %s178_s30, 128  }
  0x66   : > { %674 = vsyncadd (%p971_p0), %s178_s30, 4294967168  ;;  %p972_p11 = scmp.eq.s32.totalorder %s747_s16, 0 }
  0x68   : > { %676 = dma.done.wait (%p972_p11), [#allocation6], 80   ;;  %p973_p9 = pmov %p972_p11 }
  0x69   : > { %vm216_vm0 = vcmask 1043456   ;;  %v212_v0 = vld [vmem:[%s181_s22] sm:$0xff]  ;;  %v702_v5 = vmov 0.0   ;;  %v223_v6 = vld [vmem:[#allocation5] sm:$0xf]  ;;  %vm703_vm1 = vmmov 0   ;;  %v226_v7 = vlaneseq }
  0x6a   : > { %678 = vsyncadd (%p973_p9), [#allocation6], 4294967216  ;;  %v214_v1 = vcombine.high %v212_v0, %v212_v0  ;;  %v217_v2 = vsel %vm216_vm0, %v212_v0, 0.0  ;;  %461 = vmatprep.subr.mxu0 %v702_v5  ;;  %463 = vmatprep.mubr.msk.f32.mxu0 %vm703_vm1, %v702_v5  ;;  %vm232_vm2 = vcmask 31744   ;;  %v224_v14 = vld [vmem:[#allocation7] sm:$0x1] }
  0x6b   : > { %462 = vmatpush3.msk.msra.mxu0 %vm216_vm0, %v223_v6  ;;  %v227_v8 = vand.u32 127, %v226_v7  ;;  %v229_v9 = vshrl.u32 %v226_v7, 7  ;;  %v704_v24 = vmov 839922192   ;;  %s458_s18 = sshll.u32 %s747_s16, 7  ;;  %s211_s20 = scalar_lea.vmem [#allocation8], %s445_s27 }
  0x6c   : > { %v218_v3 = vsel %vm216_vm0, %v214_v1, 0.0  ;;  %v323_v25 = vunpack.c.l.s4 %v704_v24  ;;  %s347_s24 = sshll.u32 %s211_s20, 4  ;;  %s912_s29 = scalar_lea.hbm %s959_s3, %s458_s18  ;;  %s914_s24 = int_to_ptr.vmem [resolvable:$true] %s347_s24 }
  0x6d   : > { %v219_v4 = vadd.f32 %v218_v3, %v217_v2  ;;  %v230_v10 = vsub.s32 %v227_v8, %v229_v9  ;;  %v316_v21 = vsub.s32 0, %v229_v9  ;;  %s333_s4 = scalar_lea.sflag [#allocation4], %s892_s21  ;;  %s627_s5 = scalar_lea.vmem %s914_s24, 128 }
  0x6e   : > { %v324_v26 = vunpack.c.0.s8 %v323_v25  ;;  %p628_p2 = scmp.ne.s32.totalorder %s914_s24, %s627_s5  ;;  %s705_s16 = smov [#allocation8]  }
  0x6f   : > { %220 = vadd.xlane.f32.xlu0 %v219_v4  ;;  %s631_s6 = sshll.u32 %s705_s16, 4  ;;  %s632_s6 = int_to_ptr.vmem [resolvable:$false] %s631_s6 }
  0x70   : > { %v327_v27 = vsub.s32 %v324_v26, %v229_v9  ;;  %p629_p1 = pnand %p628_p2, %p846_p6  ;;  %s633_s7 = scalar_lea.vmem %s632_s6, 256 }
  0x71   : > { %p634_p8 = scmp.lt.s32.totalorder %s914_s24, %s632_s6  ;;  %p635_p12 = scmp.lt.s32.totalorder %s633_s7, %s627_s5 }
  0x72   : > { %p630_p4 = pneg %p629_p1 }
  0x73   : > { %p636_p3 = por %p635_p12, %p634_p8 }
  0x75   : > { %p637_p7 = pnand %p636_p3, %p630_p4 }
  0xfc   : > { %v221_v11 = vpop.xlane.xlu0 %220 }
  0xfd   : > { %v222_v12 = vmul.f32 0.00390625, %v221_v11 }
  0xff   : > { %v231_v13 = vrot.slane %v222_v12, %v230_v10 }
 0x101   : > { %464 = vmatmul.mubr.msk.f32.vlgmr.msra.gmra.mrb[0].mxu0 %vm232_vm2, %v231_v13 }
 0x1d4   : > { %v304_v15 = vpop.f32.mrb[0].mxu0 }
 0x1d5   : > { %v305_v16 = vadd.f32 %v304_v15, %v224_v14  ;;  %v465_v17 = vpop.f32.mrb[1].mxu0 }
 0x1d7   : > { %v451_v18 = vmul.f32 -1.442695, %v305_v16 }
 0x1d9   : > { %537 = vpow2.f32 %v451_v18 }
 0x1e3   : > { %v538_v19 = vpop.eup %537 }
 0x1e4   : > { %v311_v20 = vadd.f32 1.0, %v538_v19 }
 0x1e6   : > { %539 = vrcp.f32 %v311_v20 }
 0x1f0   : > { %v540_v22 = vpop.eup %539 }
 0x1f1   : > { %v317_v23 = vrot.slane %v540_v22, %v316_v21 }
 0x1f3   : > { %319 = vbcast.lane.b32.xlu0 %v317_v23, 256 }
 0x265   : > { %v320_v28 = vpop.permute.xlu0 %319 }
 0x266   : > { %v328_v29 = vrot.slane %v320_v28, %v327_v27 }
 0x268   : > { %v330_v30 = vmul.f32 %v328_v29, %v212_v0 }
 0x26a   : > { %331 = vst [vmem:[%s211_s20] sm:$0xff] %v330_v30 }
 0x26b   : > { %640 = shalt.err (!%p637_p7)
}
 0x26c   : > { %s641_s9 = scalar_lea.hbm %s912_s29, 128  ;;  %s645_s17 = scalar_lea.hbm %s959_s3, 256 }
 0x26d   : > { %p642_p10 = scmp.ne.s32.totalorder %s912_s29, %s641_s9  ;;  %p646_p0 = scmp.lt.u32.totalorder %s912_s29, %s959_s3 }
 0x26e   : > { %p647_p11 = scmp.lt.u32.totalorder %s645_s17, %s641_s9  ;;  %p649_p2 = scmp.lt.u32.totalorder %s641_s9, %s912_s29 }
 0x26f   : > { %p643_p13 = pnand %p642_p10, %p846_p6 }
 0x270   : > { %p648_p9 = por %p647_p11, %p646_p0 }
 0x271   : > { %p644_p5 = pneg %p643_p13 }
 0x272   : > { %p650_p1 = por %p649_p2, %p648_p9 }
 0x274   : > { %p651_p4 = pnand %p650_p1, %p644_p5 }
 0x276   : > { %654 = shalt.err (!%p651_p4)
}
 0x277   : > { %476 = dma.vmem_to_hbm [thread:$0]  (%p846_p6), %s914_s24, 128, %s912_s29, %s333_s4  }
 0x278 PF: > { %s359_s30 = sand.u32 1, %s685_s12   ;;  %p974_p8 = scmp.ne.s32.totalorder %s964_s19, 0 }
 0x279   : > { %p975_p12 = scmp.ge.s32.totalorder %s697_s15, 2  ;;  %s360_s22 = scalar_lea.sflag [#allocation4], %s359_s30 }
 0x27b   : > { %p490_p3 = pnand %p975_p12, %p974_p8 }
 0x27d   : > { %680 = dma.done.wait (!%p490_p3), %s360_s22, 128  }
 0x27e   : > { %682 = vsyncadd (!%p490_p3), %s360_s22, 4294967168  ;;  %p17_p7 = scmp.ge.s32.totalorder %s782_s26, 4   ;;  %s976_s12 = smov %s689_s13 }
 0x27f   : > { %s977_s13 = smov %s693_s14  ;;  %s978_s14 = smov %s842_s25 }
 0x280   : > { %s979_s15 = smov %s782_s26  ;;  %19 = sbr.rel (!%p17_p7) target bundleno = 6 (0x6), region = 85 }
 0x287   :  { %365 = vsyncpa [#allocation3], 1 }
 0x288   :  { %367 = vsyncpa [#allocation3 + $0x1], 1 }
 0x289   :  { %368 = vsyncpa [#allocation6], 1 }
 0x28a   :  { %369 = vsyncpa [#allocation4], 1 }
 0x28b   :  { %371 = vsyncpa [#allocation4 + $0x1], 1 }

// kernel: tpu_custom_call.1
= control target key start
LH: loop header
LB: loop body
LE: loop exit
PB: predicated region body
PF: predicated region fallthrough
CT: control target
= control target key end

     0   :  { %8 = vsyncpa [#allocation3], 0  ;;  %s956_s0 = inlined_call_operand.hbm [shape: f32[2,4,256], index: 0, kind: input, shape index: {}]   ;;  %s957_s1 = inlined_call_operand.hbm [shape: f32[4,4], index: 1, kind: input, shape index: {}]   ;;  %s958_s2 = inlined_call_operand.hbm [shape: f32[1,4], index: 2, kind: input, shape index: {}]   ;;  %s959_s3 = inlined_call_operand.hbm [shape: f32[2,4,256], index: 3, kind: output, shape index: {}]  }
   0x1   :  { %10 = vsyncpa [#allocation3 + $0x1], 0 }
   0x2   :  { %11 = vsyncpa [#allocation6], 0 }
   0x3   :  { %12 = vsyncpa [#allocation4], 0 }
   0x4   :  { %14 = vsyncpa [#allocation4 + $0x1], 0  ;;  %s726_s12 = smov 0   ;;  %s728_s13 = smov 0  }
   0x5   :  { %s730_s14 = smov 0   ;;  %s732_s15 = smov 0  }
   0x6 LB: > { %s747_s16 = sadd.s32 4294967295, %s697_s15   ;;  %s436_s17 = sadd.s32 4294967294, %s697_s15   ;;  %s697_s15 = sphi %s732_s15, %s979_s15   ;;  %s693_s14 = sphi %s730_s14, %s978_s14   ;;  %s689_s13 = sphi %s728_s13, %s977_s13   ;;  %s685_s12 = sphi %s726_s12, %s976_s12  }
   0x7   : > { %p40_p0 = scmp.ne.s32.totalorder %s689_s13, %s685_s12  ;;  %p960_p1 = scmp.eq.s32.totalorder %s747_s16, 0 }
   0x8   : > { %p112_p3 = scmp.eq.s32.totalorder %s436_s17, 1  ;;  %p437_p5 = scmp.ge.s32.totalorder %s697_s15, 1 }
   0x9   : > { %p756_p4 = por %p960_p1, %p40_p0  ;;  %p119_p7 = scmp.lt.s32.totalorder %s697_s15, 3 }
   0xa   : > { %p761_p6 = por %p112_p3, %p40_p0  ;;  %s699_s21 = smov [#allocation5]  }
   0xb   : > { %s963_s18 = scalar_select %p756_p4, 1, 0 }
   0xc   : > { %s964_s19 = scalar_select %p761_p6, 1, 0 }
   0xd   : > { %p766_p8 = pnand %p437_p5, %p119_p7  ;;  %s132_s22 = sshll.u32 %s699_s21, 4  ;;  %s133_s22 = int_to_ptr.vmem [resolvable:$true] %s132_s22 }
   0xe   : > { %s700_s23 = smov [#allocation7]   ;;  %s782_s26 = sadd.s32 1, %s697_s15  }
   0xf   : > { %s965_s20 = scalar_select %p766_p8, 1, 0 }
  0x10   : > { %p478_p10 = pneg %p766_p8  ;;  %s143_s24 = sshll.u32 %s700_s23, 4  ;;  %s779_s24 = int_to_ptr.vmem [resolvable:$true] %s143_s24 }
  0x11   : > { %s24_s27 = ssub.s32 %s697_s15, %s782_s26  ;;  %s541_s30 = scalar_lea.hbm %s957_s1, 64 }
  0x12   : > { %p775_p11 = pnand %p478_p10, %p960_p1  ;;  %p542_p12 = scmp.ne.s32.totalorder %s957_s1, %s541_s30 }
  0x13   : > { %p548_p5 = scmp.lt.u32.totalorder %s541_s30, %s957_s1 }
  0x14   : > { %p543_p13 = pneg %p775_p11 }
  0x16   : > { %p544_p0 = pnand %p543_p13, %p542_p12 }
  0x18   : > { %p545_p3 = pneg %p544_p0 }
  0x1a   : > { %p550_p7 = pnand %p548_p5, %p545_p3 }
  0x1c   : > { %553 = shalt.err (!%p550_p7)
}
  0x1d   : > { %s554_s8 = scalar_lea.vmem %s133_s22, 64  ;;  %p562_p2 = scmp.lt.s32.totalorder %s133_s22, %s133_s22 }
  0x1e   : > { %p555_p10 = scmp.ne.s32.totalorder %s133_s22, %s554_s8  ;;  %p563_p6 = scmp.lt.s32.totalorder %s554_s8, %s554_s8 }
  0x20   : > { %p557_p9 = pnand %p555_p10, %p543_p13  ;;  %p564_p4 = por %p563_p6, %p562_p2 }
  0x22   : > { %p558_p1 = pneg %p557_p9 }
  0x24   : > { %p565_p8 = pnand %p564_p4, %p558_p1 }
  0x26   : > { %568 = shalt.err (!%p565_p8)
}
  0x27   : > { %481 = dma.hbm_to_vmem [thread:$0]  (!%p775_p11), %s957_s1, 64, %s133_s22, [#allocation6]  }
  0x28   : > { %s569_s21 = scalar_lea.hbm %s958_s2, 16 }
  0x29   : > { %p570_p9 = scmp.ne.s32.totalorder %s958_s2, %s569_s21  ;;  %p576_p4 = scmp.lt.u32.totalorder %s569_s21, %s958_s2 }
  0x2b   : > { %p572_p2 = pnand %p570_p9, %p543_p13 }
  0x2d   : > { %p573_p1 = pneg %p572_p2 }
  0x2f   : > { %p578_p6 = pnand %p576_p4, %p573_p1 }
  0x31   : > { %581 = shalt.err (!%p578_p6)
}
  0x32   : > { %s582_s22 = scalar_lea.vmem %s779_s24, 16  ;;  %s589_s4 = scalar_lea.vmem %s779_s24, 32 }
  0x33   : > { %p583_p8 = scmp.ne.s32.totalorder %s779_s24, %s582_s22  ;;  %p590_p3 = scmp.lt.s32.totalorder %s779_s24, %s779_s24 }
  0x34   : > { %p591_p5 = scmp.lt.s32.totalorder %s589_s4, %s582_s22 }
  0x35   : > { %p585_p12 = pnand %p583_p8, %p543_p13 }
  0x36   : > { %p592_p7 = por %p591_p5, %p590_p3 }
  0x37   : > { %p586_p0 = pneg %p585_p12 }
  0x39   : > { %p593_p10 = pnand %p592_p7, %p586_p0 }
  0x3b   : > { %596 = shalt.err (!%p593_p10)
}
  0x3c   : > { %484 = dma.hbm_to_vmem [thread:$0]  (!%p775_p11), %s958_s2, 16, %s779_s24, [#allocation6]  }
  0x3d   : > { %p25_p13 = scmp.eq.s32.totalorder %s24_s27, 0  ;;  %s27_s7 = sadd.s32 1, %s693_s14 }
  0x3e   : > { %p34_p9 = scmp.ne.s32.totalorder %s693_s14, %s689_s13  ;;  %p35_p2 = scmp.eq.s32.totalorder %s697_s15, 0 }
  0x3f   : > { %s842_s25 = scalar_select %p25_p13, %s693_s14, %s27_s7  }
  0x40   : > { %p36_p1 = por %p35_p2, %p34_p9  ;;  %p967_p4 = scmp.eq.s32.totalorder %s747_s16, 1 }
  0x41   : > { %p495_p8 = scmp.lt.s32.totalorder %s697_s15, 2  ;;  %s154_s9 = sand.u32 1, %s693_s14  }
  0x42   : > { %p846_p6 = por %p967_p4, %p34_p9  ;;  %s441_s10 = sshll.u32 %s154_s9, 3 }
  0x43   : > { %s457_s11 = sshll.u32 %s697_s15, 7  ;;  %s158_s27 = scalar_lea.vmem [#allocation2], %s441_s10 }
  0x44   : > { %s856_s24 = scalar_lea.hbm %s956_s0, %s457_s11  ;;  %s166_s23 = sshll.u32 %s158_s27, 4  ;;  %s858_s23 = int_to_ptr.vmem [resolvable:$true] %s166_s23 }
  0x45   : > { %p860_p11 = pnand %p495_p8, %p36_p1  ;;  %s155_s29 = scalar_lea.sflag [#allocation3], %s154_s9 }
  0x46   : > { %s597_s30 = scalar_lea.hbm %s856_s24, 128  ;;  %s602_s5 = scalar_lea.hbm %s956_s0, 256 }
  0x47   : > { %p598_p12 = scmp.ne.s32.totalorder %s856_s24, %s597_s30  ;;  %p599_p0 = pneg %p860_p11 }
  0x48   : > { %p603_p7 = scmp.lt.u32.totalorder %s856_s24, %s956_s0  ;;  %p604_p10 = scmp.lt.u32.totalorder %s602_s5, %s597_s30 }
  0x49   : > { %p600_p3 = pnand %p599_p0, %p598_p12  ;;  %p606_p9 = scmp.lt.u32.totalorder %s597_s30, %s856_s24 }
  0x4a   : > { %p605_p13 = por %p604_p10, %p603_p7 }
  0x4b   : > { %p601_p5 = pneg %p600_p3 }
  0x4c   : > { %p607_p2 = por %p606_p9, %p605_p13 }
  0x4e   : > { %p608_p1 = pnand %p607_p2, %p601_p5 }
  0x50   : > { %611 = shalt.err (!%p608_p1)
}
  0x51   : > { %s612_s9 = scalar_lea.vmem %s858_s23, 128  ;;  %s701_s10 = smov [#allocation2]  }
  0x52   : > { %p613_p4 = scmp.ne.s32.totalorder %s858_s23, %s612_s9  ;;  %s617_s11 = sshll.u32 %s701_s10, 4  ;;  %s618_s11 = int_to_ptr.vmem [resolvable:$false] %s617_s11 }
  0x53   : > { %s619_s17 = scalar_lea.vmem %s618_s11, 256  ;;  %p620_p3 = scmp.lt.s32.totalorder %s858_s23, %s618_s11 }
  0x54   : > { %p615_p8 = pnand %p613_p4, %p599_p0  ;;  %p621_p7 = scmp.lt.s32.totalorder %s619_s17, %s612_s9 }
  0x56   : > { %p616_p12 = pneg %p615_p8  ;;  %p622_p10 = por %p621_p7, %p620_p3 }
  0x58   : > { %p623_p13 = pnand %p622_p10, %p616_p12 }
  0x5a   : > { %626 = shalt.err (!%p623_p13)
}
  0x5b   : > { %488 = dma.hbm_to_vmem [thread:$0]  (!%p860_p11), %s856_s24, 128, %s858_s23, %s155_s29  }
  0x5c   : > { %p970_p5 = scmp.ne.s32.totalorder %s965_s20, 0 }
  0x5d   : > { %s892_s21 = sand.u32 (!%p970_p5), 1, %s689_s13   ;;  %p971_p0 = scmp.ne.s32.totalorder (!%p970_p5), %s963_s18, 0 }
  0x5e   : > { %175 = sbr.rel (%p970_p5) target bundleno = 632 (0x278), region = 32  ;;  %s445_s27 = sshll.u32 (!%p970_p5), %s892_s21, 3 }
  0x5f   : > { %s178_s30 = scalar_lea.sflag (!%p970_p5), [#allocation3], %s892_s21  ;;  %s181_s22 = scalar_lea.vmem (!%p970_p5), [#allocation2], %s445_s27 }
  0x65   : > { %672 = dma.done.wait (%p971_p0), %s178_s30, 128  }
  0x66   : > { %674 = vsyncadd (%p971_p0), %s178_s30, 4294967168  ;;  %p972_p11 = scmp.eq.s32.totalorder %s747_s16, 0 }
  0x68   : > { %676 = dma.done.wait (%p972_p11), [#allocation6], 80   ;;  %p973_p9 = pmov %p972_p11 }
  0x69   : > { %vm216_vm0 = vcmask 1043456   ;;  %v212_v0 = vld [vmem:[%s181_s22] sm:$0xff]  ;;  %v702_v5 = vmov 0.0   ;;  %v223_v6 = vld [vmem:[#allocation5] sm:$0xf]  ;;  %vm703_vm1 = vmmov 0   ;;  %v226_v7 = vlaneseq }
  0x6a   : > { %678 = vsyncadd (%p973_p9), [#allocation6], 4294967216  ;;  %v214_v1 = vcombine.high %v212_v0, %v212_v0  ;;  %v217_v2 = vsel %vm216_vm0, %v212_v0, 0.0  ;;  %461 = vmatprep.subr.mxu0 %v702_v5  ;;  %463 = vmatprep.mubr.msk.f32.mxu0 %vm703_vm1, %v702_v5  ;;  %vm232_vm2 = vcmask 31744   ;;  %v224_v14 = vld [vmem:[#allocation7] sm:$0x1] }
  0x6b   : > { %462 = vmatpush3.msk.msra.mxu0 %vm216_vm0, %v223_v6  ;;  %v227_v8 = vand.u32 127, %v226_v7  ;;  %v229_v9 = vshrl.u32 %v226_v7, 7  ;;  %v704_v24 = vmov 839922192   ;;  %s458_s18 = sshll.u32 %s747_s16, 7  ;;  %s211_s20 = scalar_lea.vmem [#allocation8], %s445_s27 }
  0x6c   : > { %v218_v3 = vsel %vm216_vm0, %v214_v1, 0.0  ;;  %v323_v25 = vunpack.c.l.s4 %v704_v24  ;;  %s347_s24 = sshll.u32 %s211_s20, 4  ;;  %s912_s29 = scalar_lea.hbm %s959_s3, %s458_s18  ;;  %s914_s24 = int_to_ptr.vmem [resolvable:$true] %s347_s24 }
  0x6d   : > { %v219_v4 = vadd.f32 %v218_v3, %v217_v2  ;;  %v230_v10 = vsub.s32 %v227_v8, %v229_v9  ;;  %v316_v21 = vsub.s32 0, %v229_v9  ;;  %s333_s4 = scalar_lea.sflag [#allocation4], %s892_s21  ;;  %s627_s5 = scalar_lea.vmem %s914_s24, 128 }
  0x6e   : > { %v324_v26 = vunpack.c.0.s8 %v323_v25  ;;  %p628_p2 = scmp.ne.s32.totalorder %s914_s24, %s627_s5  ;;  %s705_s16 = smov [#allocation8]  }
  0x6f   : > { %220 = vadd.xlane.f32.xlu0 %v219_v4  ;;  %s631_s6 = sshll.u32 %s705_s16, 4  ;;  %s632_s6 = int_to_ptr.vmem [resolvable:$false] %s631_s6 }
  0x70   : > { %v327_v27 = vsub.s32 %v324_v26, %v229_v9  ;;  %p629_p1 = pnand %p628_p2, %p846_p6  ;;  %s633_s7 = scalar_lea.vmem %s632_s6, 256 }
  0x71   : > { %p634_p8 = scmp.lt.s32.totalorder %s914_s24, %s632_s6  ;;  %p635_p12 = scmp.lt.s32.totalorder %s633_s7, %s627_s5 }
  0x72   : > { %p630_p4 = pneg %p629_p1 }
  0x73   : > { %p636_p3 = por %p635_p12, %p634_p8 }
  0x75   : > { %p637_p7 = pnand %p636_p3, %p630_p4 }
  0xfc   : > { %v221_v11 = vpop.xlane.xlu0 %220 }
  0xfd   : > { %v222_v12 = vmul.f32 0.00390625, %v221_v11 }
  0xff   : > { %v231_v13 = vrot.slane %v222_v12, %v230_v10 }
 0x101   : > { %464 = vmatmul.mubr.msk.f32.vlgmr.msra.gmra.mrb[0].mxu0 %vm232_vm2, %v231_v13 }
 0x1d4   : > { %v304_v15 = vpop.f32.mrb[0].mxu0 }
 0x1d5   : > { %v305_v16 = vadd.f32 %v304_v15, %v224_v14  ;;  %v465_v17 = vpop.f32.mrb[1].mxu0 }
 0x1d7   : > { %v451_v18 = vmul.f32 -1.442695, %v305_v16 }
 0x1d9   : > { %537 = vpow2.f32 %v451_v18 }
 0x1e3   : > { %v538_v19 = vpop.eup %537 }
 0x1e4   : > { %v311_v20 = vadd.f32 1.0, %v538_v19 }
 0x1e6   : > { %539 = vrcp.f32 %v311_v20 }
 0x1f0   : > { %v540_v22 = vpop.eup %539 }
 0x1f1   : > { %v317_v23 = vrot.slane %v540_v22, %v316_v21 }
 0x1f3   : > { %319 = vbcast.lane.b32.xlu0 %v317_v23, 256 }
 0x265   : > { %v320_v28 = vpop.permute.xlu0 %319 }
 0x266   : > { %v328_v29 = vrot.slane %v320_v28, %v327_v27 }
 0x268   : > { %v330_v30 = vmul.f32 %v328_v29, %v212_v0 }
 0x26a   : > { %331 = vst [vmem:[%s211_s20] sm:$0xff] %v330_v30 }
 0x26b   : > { %640 = shalt.err (!%p637_p7)
}
 0x26c   : > { %s641_s9 = scalar_lea.hbm %s912_s29, 128  ;;  %s645_s17 = scalar_lea.hbm %s959_s3, 256 }
 0x26d   : > { %p642_p10 = scmp.ne.s32.totalorder %s912_s29, %s641_s9  ;;  %p646_p0 = scmp.lt.u32.totalorder %s912_s29, %s959_s3 }
 0x26e   : > { %p647_p11 = scmp.lt.u32.totalorder %s645_s17, %s641_s9  ;;  %p649_p2 = scmp.lt.u32.totalorder %s641_s9, %s912_s29 }
 0x26f   : > { %p643_p13 = pnand %p642_p10, %p846_p6 }
 0x270   : > { %p648_p9 = por %p647_p11, %p646_p0 }
 0x271   : > { %p644_p5 = pneg %p643_p13 }
 0x272   : > { %p650_p1 = por %p649_p2, %p648_p9 }
 0x274   : > { %p651_p4 = pnand %p650_p1, %p644_p5 }
 0x276   : > { %654 = shalt.err (!%p651_p4)
}
 0x277   : > { %476 = dma.vmem_to_hbm [thread:$0]  (%p846_p6), %s914_s24, 128, %s912_s29, %s333_s4  }
 0x278 PF: > { %s359_s30 = sand.u32 1, %s685_s12   ;;  %p974_p8 = scmp.ne.s32.totalorder %s964_s19, 0 }
 0x279   : > { %p975_p12 = scmp.ge.s32.totalorder %s697_s15, 2  ;;  %s360_s22 = scalar_lea.sflag [#allocation4], %s359_s30 }
 0x27b   : > { %p490_p3 = pnand %p975_p12, %p974_p8 }
 0x27d   : > { %680 = dma.done.wait (!%p490_p3), %s360_s22, 128  }
 0x27e   : > { %682 = vsyncadd (!%p490_p3), %s360_s22, 4294967168  ;;  %p17_p7 = scmp.ge.s32.totalorder %s782_s26, 4   ;;  %s976_s12 = smov %s689_s13 }
 0x27f   : > { %s977_s13 = smov %s693_s14  ;;  %s978_s14 = smov %s842_s25 }
 0x280   : > { %s979_s15 = smov %s782_s26  ;;  %19 = sbr.rel (!%p17_p7) target bundleno = 6 (0x6), region = 85 }
 0x287   :  { %365 = vsyncpa [#allocation3], 1 }
 0x288   :  { %367 = vsyncpa [#allocation3 + $0x1], 1 }
 0x289   :  { %368 = vsyncpa [#allocation6], 1 }
 0x28a   :  { %369 = vsyncpa [#allocation4], 1 }
 0x28b   :  { %371 = vsyncpa [#allocation4 + $0x1], 1 }

</bundles_post_ra>
